<compile_context>
chip_gen: v7x
topology: tpu7x:2x2x1
jax: 0.10.0
libtpu: 0.0.40
codegen_flags: <defaults>
</compile_context>

<pallas_src>
import math

import jax
import jax.numpy as jnp
from jax.experimental import pallas as pl
from jax.experimental.pallas import tpu as pltpu


def _round_up(x, m):
    return (x + m - 1) // m * m


def _sparse_linear_kernel(x_ref, w_ref, b_ref, o_ref, acc_ref):
    k = pl.program_id(2)

    @pl.when(k == 0)
    def _():
        acc_ref[...] = jnp.zeros_like(acc_ref)

    # MXU matmul with f32 accumulation; weight tile is already [tk, tn], so the
    # contraction is on K directly (no in-kernel transpose).
    acc_ref[...] += jnp.dot(x_ref[...], w_ref[...],
                            preferred_element_type=jnp.float32)

    @pl.when(k == pl.num_programs(2) - 1)
    def _():
        # Bias add only once, in the finalize branch.
        o_ref[...] = (acc_ref[...] + b_ref[...]).astype(o_ref.dtype)


def sparse_linear_forward(x, weight, mask, bias, *, tm=128, tn=256, tk=512):
    """Eval-mode forward of SparseWeightsBase wrapping nn.Linear.

    x:      [M, K]
    weight: [N, K]   (PyTorch nn.Linear convention)
    mask:   [N, K]   1.0 where the weight is kept, 0.0 where zeroed
    bias:   [N]
    -> [M, N]
    """
    M, K = x.shape
    N, K2 = weight.shape
    assert K == K2

    # rezeroWeights(): in eval mode the module weight is already sparsified;
    # mask once outside the hot loop and pre-transpose to [K, N] so the kernel
    # contracts on K and the output is lane-dense on N.
    # TODO(synk): optional bf16 cast of x / w_kn for the v6e MXU (918 TF/s is
    # bf16-only); kept f32 here to preserve tight numerics for the sanity check.
    w_kn = (weight * mask).T

    # Clamp tiles to the (padded) problem size; keep lane/sublane alignment.
    tm = min(tm, _round_up(M, 8))
    tk = min(tk, _round_up(K, 128))
    tn = min(tn, _round_up(N, 128))

    Mp, Kp, Np = _round_up(M, tm), _round_up(K, tk), _round_up(N, tn)

    if (Mp, Kp) != (M, K):
        x = jnp.pad(x, ((0, Mp - M), (0, Kp - K)))
    if (Kp, Np) != (K, N):
        w_kn = jnp.pad(w_kn, ((0, Kp - K), (0, Np - N)))
    bias2d = bias.reshape(1, N)
    if Np != N:
        bias2d = jnp.pad(bias2d, ((0, 0), (0, Np - N)))

    grid = (Mp // tm, Np // tn, Kp // tk)

    out = pl.pallas_call(
        _sparse_linear_kernel,
        out_shape=jax.ShapeDtypeStruct((Mp, Np), x.dtype),
        grid_spec=pltpu.PrefetchScalarGridSpec(
            num_scalar_prefetch=0,
            grid=grid,
            in_specs=[
                pl.BlockSpec((tm, tk), lambda i, j, k: (i, k)),   # x tile
                pl.BlockSpec((tk, tn), lambda i, j, k: (k, j)),   # pre-masked W^T tile
                pl.BlockSpec((1, tn), lambda i, j, k: (0, j)),    # bias strip
            ],
            out_specs=pl.BlockSpec((tm, tn), lambda i, j, k: (i, j)),
            scratch_shapes=[pltpu.VMEM((tm, tn), jnp.float32)],
        ),
        compiler_params=pltpu.CompilerParams(
            dimension_semantics=("parallel", "parallel", "arbitrary"),
            vmem_limit_bytes=32 * 1024 * 1024,
        ),
    )(x, w_kn, bias2d)

    return out[:M, :N]


def make_sparse_linear_params(key, in_features, out_features, weight_sparsity):
    """Deterministic parameter + zero-mask construction.

    Mirrors SparseWeightsBase.__init__ / computeIndices for the Linear case:
    for each output unit, only `round(weight_sparsity * in_features)` randomly
    selected weights are allowed to be non-zero.
    """
    assert 0.0 < weight_sparsity < 1.0
    kw, kb, km = jax.random.split(key, 3)

    # nn.Linear default init: U(-1/sqrt(in), 1/sqrt(in))
    bound = 1.0 / math.sqrt(in_features)
    weight = jax.random.uniform(
        kw, (out_features, in_features), jnp.float32, -bound, bound
    )
    bias = jax.random.uniform(kb, (out_features,), jnp.float32, -bound, bound)

    # computeIndices(): per output unit pick which weights stay non-zero.
    num_nonzero = int(round(weight_sparsity * in_features))
    scores = jax.random.uniform(km, (out_features, in_features))
    ranks = jnp.argsort(jnp.argsort(scores, axis=1), axis=1)
    mask = (ranks < num_nonzero).astype(jnp.float32)
    return weight, bias, mask


if __name__ == "__main__":
    batch = 8
    in_features = 256
    out_features = 192
    weight_sparsity = 0.5

    key = jax.random.PRNGKey(0)
    kx, kp = jax.random.split(key)

    x = jax.random.normal(kx, (batch, in_features), jnp.float32)
    weight, bias, mask = make_sparse_linear_params(
        kp, in_features, out_features, weight_sparsity
    )

    # Small tiles so the example exercises N tiling, the K-reduction
    # accumulator, and N padding (192 -> 256) with the post-call slice.
    y = sparse_linear_forward(x, weight, mask, bias, tm=8, tn=128, tk=128)
    y = jax.block_until_ready(y)

    # Sanity check against plain JAX reference (eval-mode forward semantics).
    y_ref = x @ (weight * mask).T + bias[None, :]
    assert jnp.allclose(y, y_ref, atol=1e-3, rtol=1e-3), float(
        jnp.max(jnp.abs(y - y_ref))
    )

    # TODO(synk): computeIndices/rezeroWeights are abstract in the base class;
    # the Linear-style per-unit random mask above is the canonical subclass
    # behavior. train()-mode index resampling / weight_data bookkeeping is
    # stateful host logic and not part of the forward hot path.
    print("KERNEL_OK")
</pallas_src>

<mosaic_0001>
module attributes {stable_mosaic.version = 11 : i64} {
  func.func @_sparse_linear_kernel(%arg0: i32, %arg1: i32, %arg2: i32, %arg3: memref<8x128xf32, #tpu.memory_space<vmem>>, %arg4: memref<128x128xf32, #tpu.memory_space<vmem>>, %arg5: memref<1x128xf32, #tpu.memory_space<vmem>>, %arg6: memref<8x128xf32, #tpu.memory_space<vmem>>, %arg7: memref<8x128xf32, #tpu.memory_space<vmem>>) attributes {dimension_semantics = [#tpu.dimension_semantics<parallel>, #tpu.dimension_semantics<parallel>, #tpu.dimension_semantics<arbitrary>], iteration_bounds = array<i64: 1, 2, 2>, scalar_prefetch = 0 : i64, scratch_operands = 1 : i64, tpu.core_type = #tpu.core_type<tc>, window_params = [{transform_indices = @transform_0, window_bounds = array<i64: 8, 128>}, {transform_indices = @transform_1, window_bounds = array<i64: 128, 128>}, {transform_indices = @transform_2, window_bounds = array<i64: 1, 128>}, {transform_indices = @transform_3, window_bounds = array<i64: 8, 128>}]} {
    %c0_i32 = arith.constant 0 : i32
    %0 = arith.cmpi eq, %arg2, %c0_i32 : i32
    %1 = arith.extui %0 : i1 to i32
    %c0_i32_0 = arith.constant 0 : i32
    %2 = arith.cmpi ne, %1, %c0_i32_0 : i32
    scf.if %2 {
      %cst_9 = arith.constant 0.000000e+00 : f32
      %12 = vector.broadcast %cst_9 : f32 to vector<8x128xf32>
      %c0_10 = arith.constant 0 : index
      %c0_11 = arith.constant 0 : index
      %13 = vector.load %arg7[%c0_10, %c0_11] : memref<8x128xf32, #tpu.memory_space<vmem>>, vector<8x128xf32>
      tpu.vector_store %arg7[%c0_10, %c0_11], %12 {strides = array<i32>} : memref<8x128xf32, #tpu.memory_space<vmem>>, vector<8x128xf32>,
    } else {
    }
    %c0 = arith.constant 0 : index
    %c0_1 = arith.constant 0 : index
    %3 = vector.load %arg7[%c0, %c0_1] : memref<8x128xf32, #tpu.memory_space<vmem>>, vector<8x128xf32>
    %c0_2 = arith.constant 0 : index
    %c0_3 = arith.constant 0 : index
    %4 = vector.load %arg3[%c0_2, %c0_3] : memref<8x128xf32, #tpu.memory_space<vmem>>, vector<8x128xf32>
    %c0_4 = arith.constant 0 : index
    %c0_5 = arith.constant 0 : index
    %5 = vector.load %arg4[%c0_4, %c0_5] : memref<128x128xf32, #tpu.memory_space<vmem>>, vector<128x128xf32>
    %cst = arith.constant dense<0.000000e+00> : vector<8x128xf32>
    %6 = tpu.matmul %4, %5, %cst {dimension_numbers = #tpu.dot_dimension_numbers<[1], [0], [0], [1], [0, 0, 1, 1], [], []>} : vector<8x128xf32>, vector<128x128xf32>, vector<8x128xf32> -> vector<8x128xf32>
    %7 = arith.addf %3, %6 : vector<8x128xf32>
    %c0_6 = arith.constant 0 : index
    %c0_7 = arith.constant 0 : index
    %8 = vector.load %arg7[%c0_6, %c0_7] : memref<8x128xf32, #tpu.memory_space<vmem>>, vector<8x128xf32>
    tpu.vector_store %arg7[%c0_6, %c0_7], %7 {strides = array<i32>} : memref<8x128xf32, #tpu.memory_space<vmem>>, vector<8x128xf32>,
    %c1_i32 = arith.constant 1 : i32
    %9 = arith.cmpi eq, %arg2, %c1_i32 : i32
    %10 = arith.extui %9 : i1 to i32
    %c0_i32_8 = arith.constant 0 : i32
    %11 = arith.cmpi ne, %10, %c0_i32_8 : i32
    scf.if %11 {
      %c0_9 = arith.constant 0 : index
      %c0_10 = arith.constant 0 : index
      %12 = vector.load %arg7[%c0_9, %c0_10] : memref<8x128xf32, #tpu.memory_space<vmem>>, vector<8x128xf32>
      %c0_11 = arith.constant 0 : index
      %c0_12 = arith.constant 0 : index
      %13 = vector.load %arg5[%c0_11, %c0_12] : memref<1x128xf32, #tpu.memory_space<vmem>>, vector<1x128xf32>
      %14 = vector.broadcast %13 : vector<1x128xf32> to vector<8x128xf32>
      %15 = arith.addf %12, %14 : vector<8x128xf32>
      %c0_13 = arith.constant 0 : index
      %c0_14 = arith.constant 0 : index
      %16 = vector.load %arg6[%c0_13, %c0_14] : memref<8x128xf32, #tpu.memory_space<vmem>>, vector<8x128xf32>
      tpu.vector_store %arg6[%c0_13, %c0_14], %15 {strides = array<i32>} : memref<8x128xf32, #tpu.memory_space<vmem>>, vector<8x128xf32>,
    } else {
    }
    return
  }
  func.func @transform_0(%arg0: i32, %arg1: i32, %arg2: i32) -> (i32, i32) {
    %c0_i32 = arith.constant 0 : i32
    return %arg0, %arg2 : i32, i32
  }
  func.func @transform_1(%arg0: i32, %arg1: i32, %arg2: i32) -> (i32, i32) {
    %c0_i32 = arith.constant 0 : i32
    return %arg2, %arg1 : i32, i32
  }
  func.func @transform_2(%arg0: i32, %arg1: i32, %arg2: i32) -> (i32, i32) {
    %c0_i32 = arith.constant 0 : i32
    %c0_i32_0 = arith.constant 0 : i32
    return %c0_i32, %arg1 : i32, i32
  }
  func.func @transform_3(%arg0: i32, %arg1: i32, %arg2: i32) -> (i32, i32) {
    %c0_i32 = arith.constant 0 : i32
    return %arg0, %arg1 : i32, i32
  }
}

</mosaic_0001>

<bundles_post_ra>
// kernel: tpu_custom_call.1
= control target key start
LH: loop header
LB: loop body
LE: loop exit
PB: predicated region body
PF: predicated region fallthrough
CT: control target
= control target key end

     0   :  { %s1374_s0 = inlined_call_operand.hbm [shape: f32[8,256], index: 0, kind: input, shape index: {}]   ;;  %s1375_s1 = inlined_call_operand.hbm [shape: f32[256,256], index: 1, kind: input, shape index: {}]   ;;  %s1376_s2 = inlined_call_operand.vmem [shape: f32[1,256], index: 2, kind: input, shape index: {}]   ;;  %s1377_s3 = inlined_call_operand.hbm [shape: f32[8,256], index: 3, kind: output, shape index: {}]  }
   0x1   :  { %1385 = sst [smem:[#allocation19_spill]] %s1374_s0 }
   0x2   :  { %8 = vsyncpa [#allocation4], 0 }
   0x3   :  { %10 = vsyncpa [#allocation4 + $0x1], 0 }
   0x4   :  { %11 = vsyncpa [#allocation7], 0 }
   0x5   :  { %13 = vsyncpa [#allocation7 + $0x1], 0 }
   0x6   :  { %14 = vsyncpa [#allocation5], 0 }
   0x7   :  { %16 = vsyncpa [#allocation5 + $0x1], 0  ;;  %s995_s12 = smov 0   ;;  %s997_s13 = smov 0  }
   0x8   :  { %s999_s14 = smov 0   ;;  %s1001_s15 = smov 0  }
   0x9   :  { %s1003_s16 = smov 0   ;;  %s1005_s17 = smov 0  }
   0xa   :  { %s1007_s18 = smov 0   ;;  %s1009_s19 = smov 0  }
   0xb   :  { %s1011_s20 = smov 0   ;;  %s1013_s21 = smov 0  }
   0xc   :  { %s1015_s22 = smov 0   ;;  %s1017_s23 = smov 0  }
   0xd   :  { %s1019_s24 = smov 0   ;;  %s1021_s25 = smov 0  }
   0xe LB: > { %1386 = sst [smem:[#allocation12_spill]] %s943_s20  ;;  %s517_s26 = sadd.s32 4294967295, %s963_s25   ;;  %s963_s25 = sphi %s1021_s25, %s22_s25   ;;  %s959_s24 = sphi %s1019_s24, %s1418_s24   ;;  %s955_s23 = sphi %s1017_s23, %s1430_s23   ;;  %s951_s22 = sphi %s1015_s22, %s1416_s22   ;;  %s947_s21 = sphi %s1013_s21, %s1429_s21   ;;  %s943_s20 = sphi %s1011_s20, %s1428_s20   ;;  %s939_s19 = sphi %s1009_s19, %s1427_s19   ;;  %s935_s18 = sphi %s1007_s18, %s1426_s18   ;;  %s931_s17 = sphi %s1005_s17, %s1425_s17   ;;  %s927_s16 = sphi %s1003_s16, %s1424_s16   ;;  %s923_s15 = sphi %s1001_s15, %s1423_s15   ;;  %s919_s14 = sphi %s999_s14, %s1422_s14   ;;  %s915_s13 = sphi %s997_s13, %s1421_s13   ;;  %s911_s12 = sphi %s995_s12, %s1420_s12  }
   0xf   : > { %1387 = sst [smem:[#allocation13_spill]] %s959_s24  ;;  %s34_s28 = sadd.s32 1, %s955_s23 }
  0x10   : > { %s37_s29 = sadd.s32 1, %s959_s24  ;;  %p35_p0 = scmp.ge.s32.totalorder %s34_s28, 2 }
  0x11   : > { %s50_s30 = sadd.s32 1, %s943_s20  ;;  %p57_p1 = scmp.ne.s32.totalorder %s943_s20, %s939_s19 }
  0x12   : > { %p58_p2 = scmp.eq.s32.totalorder %s963_s25, 0  ;;  %s1432_s28 = smov (%p35_p0, %s34_s28), 0 }
  0x13   : > { %1388 = sst [smem:[#allocation14_spill]] %s1432_s28  ;;  %s1434_s29 = smov (!%p35_p0, %s37_s29), %s959_s24 }
  0x14   : > { %s46_s4 = ssub.s32 %s955_s23, %s1432_s28  ;;  %p1078_p3 = por %p58_p2, %p57_p1 }
  0x15   : > { %p39_p4 = scmp.ge.s32.totalorder %s1434_s29, 2  ;;  %p48_p5 = scmp.eq.s32.totalorder %s46_s4, 0 }
  0x16   : > { %p63_p6 = scmp.ne.s32.totalorder %s939_s19, %s935_s18  ;;  %p1085_p7 = scmp.eq.s32.totalorder %s517_s26, 0 }
  0x17   : > { %s1436_s29 = smov (%p39_p4, %s1434_s29), 0  ;;  %s78_s11 = sadd.s32 1, %s931_s17 }
  0x18   : > { %1391 = sst [smem:[#allocation15_spill]] %s1436_s29  ;;  %p1096_p8 = por %p1085_p7, %p63_p6 }
  0x19   : > { %s1092_s7 = scalar_select %p48_p5, %s943_s20, %s50_s30  }
  0x1a   : > { %s1393_s8 = scalar_select %p1096_p8, 1, 0 }
  0x1b   : > { %1392 = sst [smem:[#allocation16_spill]] %s1092_s7  ;;  %s74_s9 = ssub.s32 %s959_s24, %s1436_s29 }
  0x1c   : > { %s75_s10 = sor.u32 %s74_s9, %s46_s4  ;;  %p85_p10 = scmp.ne.s32.totalorder %s931_s17, %s927_s16 }
  0x1d   : > { %p76_p9 = scmp.eq.s32.totalorder %s75_s10, 0  ;;  %p91_p11 = scmp.ne.s32.totalorder %s927_s16, %s923_s15 }
  0x1e   : > { %p130_p12 = scmp.eq.s32.totalorder %s74_s9, 0  ;;  %p1112_p13 = por %p85_p10, %p58_p2 }
  0x1f   : > { %s1108_s18 = scalar_select %p76_p9, %s931_s17, %s78_s11  }
  0x20   : > { %p1118_p0 = por %p91_p11, %p1085_p7  ;;  %s132_s4 = sadd.s32 1, %s919_s14 }
  0x21   : > { %1394 = sst [smem:[#allocation17_spill]] %s1108_s18  ;;  %p142_p1 = scmp.ne.s32.totalorder %s919_s14, %s915_s13 }
  0x22   : > { %s1396_s27 = scalar_select %p1118_p0, 1, 0 }
  0x23   : > { %s1126_s10 = scalar_select %p130_p12, %s919_s14, %s132_s4  }
  0x24   : > { %p143_p4 = scmp.eq.s32.totalorder %s517_s26, 3  ;;  %p148_p5 = scmp.ne.s32.totalorder %s915_s13, %s911_s12 }
  0x25   : > { %1397 = sst [smem:[#allocation18_spill]] %s1126_s10  ;;  %s1398_s15 = sadd.s32 4294967294, %s963_s25  }
  0x26   : > { %p149_p2 = scmp.eq.s32.totalorder %s1398_s15, 3  ;;  %p1134_p6 = por %p143_p4, %p142_p1 }
  0x27   : > { %p632_p7 = scmp.lt.s32.totalorder %s963_s25, 4  ;;  %s169_s11 = sand.u32 1, %s943_s20  }
  0x28   : > { %s1399_s9 = scalar_select %p1134_p6, 1, 0 }
  0x29   : > { %p1139_p9 = por %p149_p2, %p148_p5  ;;  %s521_s29 = sshll.u32 %s169_s11, 3 }
  0x2a   : > { %s522_s4 = sshll.u32 %s955_s23, 7  ;;  %s1401_s0 = sld [smem:[#allocation19_spill]] }
  0x2b   : > { %s1400_s6 = scalar_select %p1139_p9, 1, 0 }
  0x2c   : > { %s173_s15 = scalar_lea.vmem [#allocation3], %s521_s29  ;;  %p1154_p10 = pnand %p632_p7, %p1078_p3 }
  0x2d   : > { %s182_s18 = sshll.u32 %s173_s15, 4  ;;  %p1161_p11 = pnand %p632_p7, %p1112_p13  ;;  %s1150_s18 = int_to_ptr.vmem [resolvable:$true] %s182_s18 }
  0x2e   : > { %s170_s7 = scalar_lea.sflag [#allocation4], %s169_s11  ;;  %p755_p4 = pneg %p1154_p10 }
  0x30   : > { %s1148_s26 = scalar_lea.hbm %s1401_s0, %s522_s4  ;;  %s758_s15 = scalar_lea.hbm %s1401_s0, 256 }
  0x31   : > { %s753_s29 = scalar_lea.hbm %s1148_s26, 128  ;;  %p759_p13 = scmp.lt.u32.totalorder %s1148_s26, %s1401_s0 }
  0x32   : > { %p754_p1 = scmp.ne.s32.totalorder %s1148_s26, %s753_s29  ;;  %p760_p2 = scmp.lt.u32.totalorder %s758_s15, %s753_s29 }
  0x33   : > { %p762_p12 = scmp.lt.u32.totalorder %s753_s29, %s1148_s26 }
  0x34   : > { %p756_p3 = pnand %p755_p4, %p754_p1  ;;  %p761_p7 = por %p760_p2, %p759_p13 }
  0x36   : > { %p757_p5 = pneg %p756_p3  ;;  %p763_p9 = por %p762_p12, %p761_p7 }
  0x38   : > { %p764_p6 = pnand %p763_p9, %p757_p5 }
  0x3a   : > { %767 = shalt.err (!%p764_p6)
}
  0x3b   : > { %s768_s11 = scalar_lea.vmem %s1150_s18, 128  ;;  %s965_s5 = smov [#allocation3]  }
  0x3c   : > { %p769_p1 = scmp.ne.s32.totalorder %s1150_s18, %s768_s11  ;;  %s773_s4 = sshll.u32 %s965_s5, 4  ;;  %s774_s4 = int_to_ptr.vmem [resolvable:$false] %s773_s4 }
  0x3d   : > { %s775_s20 = scalar_lea.vmem %s774_s4, 256  ;;  %p776_p8 = scmp.lt.s32.totalorder %s1150_s18, %s774_s4 }
  0x3e   : > { %p771_p3 = pnand %p769_p1, %p755_p4  ;;  %p777_p13 = scmp.lt.s32.totalorder %s775_s20, %s768_s11 }
  0x40   : > { %p772_p0 = pneg %p771_p3  ;;  %p778_p2 = por %p777_p13, %p776_p8 }
  0x42   : > { %p779_p12 = pnand %p778_p2, %p772_p0 }
  0x44   : > { %782 = shalt.err (!%p779_p12)
}
  0x45   : > { %624 = dma.hbm_to_vmem [thread:$0]  (!%p1154_p10), %s1148_s26, 128, %s1150_s18, %s170_s7  }
  0x46   : > { %p216_p6 = scmp.lt.s32.totalorder %s963_s25, 5  ;;  %s189_s29 = sand.u32 1, %s931_s17  }
  0x47   : > { %s1404_s15 = sshll.u32 %s955_s23, 5  ;;  %p1405_p9 = scmp.ge.s32.totalorder %s963_s25, 1 }
  0x48   : > { %s199_s30 = sadd.s32 %s959_s24, %s1404_s15  ;;  %s523_s10 = sshll.u32 %s189_s29, 7 }
  0x49   : > { %p1198_p8 = pnand %p1405_p9, %p216_p6  ;;  %s526_s5 = sshll.u32 %s199_s30, 7 }
  0x4a   : > { %s1205_s0 = scalar_lea.hbm %s1375_s1, %s526_s5  ;;  %s193_s18 = scalar_lea.vmem [#allocation6], %s523_s10 }
  0x4b   : > { %s202_s26 = sshll.u32 %s193_s18, 4  ;;  %s1209_s7 = scalar_lea.sflag [#allocation7], %s189_s29  ;;  %s1207_s26 = int_to_ptr.vmem [resolvable:$true] %s202_s26 }
  0x4c   : > { %s783_s15 = scalar_lea.hbm %s1205_s0, 2048  ;;  %p785_p10 = pneg %p1161_p11 }
  0x4d   : > { %p784_p0 = scmp.ne.s32.totalorder %s1205_s0, %s783_s15  ;;  %s788_s4 = scalar_lea.hbm %s1375_s1, 8192 }
  0x4e   : > { %p789_p7 = scmp.lt.u32.totalorder %s1205_s0, %s1375_s1  ;;  %p790_p1 = scmp.lt.u32.totalorder %s788_s4, %s783_s15 }
  0x4f   : > { %p786_p4 = pnand %p785_p10, %p784_p0  ;;  %p792_p13 = scmp.lt.u32.totalorder %s783_s15, %s1205_s0 }
  0x50   : > { %p791_p3 = por %p790_p1, %p789_p7 }
  0x51   : > { %p787_p5 = pneg %p786_p4 }
  0x52   : > { %p793_p2 = por %p792_p13, %p791_p3 }
  0x54   : > { %p794_p12 = pnand %p793_p2, %p787_p5 }
  0x56   : > { %797 = shalt.err (!%p794_p12)
}
  0x57   : > { %s798_s29 = scalar_lea.vmem %s1207_s26, 2048  ;;  %s966_s10 = smov [#allocation6]  }
  0x58   : > { %p799_p6 = scmp.ne.s32.totalorder %s1207_s26, %s798_s29  ;;  %s803_s18 = sshll.u32 %s966_s10, 4  ;;  %s804_s18 = int_to_ptr.vmem [resolvable:$false] %s803_s18 }
  0x59   : > { %s805_s24 = scalar_lea.vmem %s804_s18, 4096  ;;  %p806_p4 = scmp.lt.s32.totalorder %s1207_s26, %s804_s18 }
  0x5a   : > { %p801_p9 = pnand %p799_p6, %p785_p10  ;;  %p807_p7 = scmp.lt.s32.totalorder %s805_s24, %s798_s29 }
  0x5c   : > { %p802_p0 = pneg %p801_p9  ;;  %p808_p1 = por %p807_p7, %p806_p4 }
  0x5e   : > { %p809_p3 = pnand %p808_p1, %p802_p0 }
  0x60   : > { %812 = shalt.err (!%p809_p3)
}
  0x61   : > { %s967_s15 = smov 256   ;;  %s968_s30 = smov 128  }
  0x62   : > { %s969_s5 = smov 8   ;;  %220 = sbr.rel (%p1198_p8) target bundleno = 404 (0x194), region = 32 }
  0x63   : > { %627 = dma.hbm_to_vmem [thread:$0]  (!%p1161_p11), %s1205_s0, 2048, %s1207_s26, %s1209_s7, %s967_s15, %s968_s30, %s969_s5  }
  0x64   : > { %s222_s4 = sand.u32 (!%p1198_p8), 1, %s939_s19   ;;  %p1407_p10 = scmp.ne.s32.totalorder (!%p1198_p8), %s1393_s8, 0 }
  0x65   : > { %s1240_s20 = sshll.u32 (!%p1198_p8), %s222_s4, 3  ;;  %s223_s29 = scalar_lea.sflag (!%p1198_p8), [#allocation4], %s222_s4 }
  0x66   : > { %s226_s10 = scalar_lea.vmem (!%p1198_p8), [#allocation3], %s1240_s20 }
  0x69   : > { %898 = dma.done.wait (%p1407_p10), %s223_s29, 128  }
  0x6a   : > { %900 = vsyncadd (%p1407_p10), %s223_s29, 4294967168  ;;  %s231_s28 = sand.u32 1, %s927_s16   ;;  %p1408_p11 = scmp.ne.s32.totalorder %s1396_s27, 0 }
  0x6b   : > { %s529_s0 = sshll.u32 %s231_s28, 7  ;;  %s232_s26 = scalar_lea.sflag [#allocation7], %s231_s28 }
  0x6c   : > { %s1248_s11 = scalar_lea.vmem [#allocation6], %s529_s0 }
  0x6d   : > { %902 = dma.done.wait (%p1408_p11), %s232_s26, 2048  }
  0x6e   : > { %904 = vsyncadd (%p1408_p11), %s232_s26, 4294965248  ;;  %s263_s7 = sand.u32 1, %s915_s13   ;;  %p267_p8 = scmp.lt.s32.totalorder %s951_s22, 1 }
  0x6f   : > { %s1258_s8 = sshll.u32 %s263_s7, 3  ;;  %p531_p5 = scmp.ne.s32.totalorder %s947_s21, 0 }
  0x70   : > { %s1261_s18 = scalar_select %p267_p8, %s951_s22, 1 }
  0x71   : > { %s265_s5 = scalar_lea.vmem [#allocation8], %s1258_s8  ;;  %273 = sbr.rel (%p531_p5) target bundleno = 120 (0x78), region = 44  ;;  %v970_v0 = vmov (!%p531_p5), 0.0  }
  0x72   : > { %s269_s30 = scalar_lea.vmem %s1376_s2, %s1261_s18  ;;  %274 = vst [vmem:[#allocation2] sm:$0xff] (!%p531_p5), %v970_v0 }
  0x78 PF: > { %v277_v1 = vld [vmem:[%s1248_s11] sm:$0xff]  ;;  %v278_v2 = vld [vmem:[%s1248_s11 + $0x8] sm:$0xff]  ;;  %v279_v3 = vld [vmem:[%s1248_s11 + $0x10] sm:$0xff]  ;;  %v971_v4 = vmov 0.0|0.0   ;;  %vm972_vm0 = vmmov 0   ;;  %v973_v7 = vmov 0.0  }
  0x79   : > { %591 = vmatprep.subr.bf16.mxu0 %v971_v4  ;;  %v592_v5 = vpack.c.bf16 %v278_v2, %v277_v1  ;;  %v280_v6 = vld [vmem:[%s1248_s11 + $0x18] sm:$0xff]  ;;  %588 = vmatprep.mubr.msk.f32.mxu0 %vm972_vm0, %v973_v7  ;;  %v281_v9 = vld [vmem:[%s1248_s11 + $0x20] sm:$0xff]  ;;  %v282_v10 = vld [vmem:[%s1248_s11 + $0x28] sm:$0xff]  ;;  %p532_p13 = scmp.ne.s32.totalorder %s947_s21, 1 }
  0x7a   : > { %v595_v8 = vpack.c.bf16 %v280_v6, %v279_v3  ;;  %v598_v11 = vpack.c.bf16 %v282_v10, %v281_v9  ;;  %v283_v12 = vld [vmem:[%s1248_s11 + $0x30] sm:$0xff]  ;;  %v284_v13 = vld [vmem:[%s1248_s11 + $0x38] sm:$0xff]  ;;  %v285_v15 = vld [vmem:[%s1248_s11 + $0x40] sm:$0xff] }
  0x7b   : > { %593 = vmatpush3.bf16.msra.mxu0 %v592_v5  ;;  %v601_v14 = vpack.c.bf16 %v284_v13, %v283_v12  ;;  %v286_v16 = vld [vmem:[%s1248_s11 + $0x48] sm:$0xff]  ;;  %v287_v18 = vld [vmem:[%s1248_s11 + $0x50] sm:$0xff]  ;;  %v288_v19 = vld [vmem:[%s1248_s11 + $0x58] sm:$0xff] }
  0x7c   : > { %594 = vmatprep.subr.bf16.mxu0 %v971_v4  ;;  %v604_v17 = vpack.c.bf16 %v286_v16, %v285_v15  ;;  %v607_v20 = vpack.c.bf16 %v288_v19, %v287_v18  ;;  %v289_v21 = vld [vmem:[%s1248_s11 + $0x60] sm:$0xff]  ;;  %v290_v22 = vld [vmem:[%s1248_s11 + $0x68] sm:$0xff]  ;;  %v291_v24 = vld [vmem:[%s1248_s11 + $0x70] sm:$0xff] }
  0x7d   : > { %v610_v23 = vpack.c.bf16 %v290_v22, %v289_v21  ;;  %v292_v25 = vld [vmem:[%s1248_s11 + $0x78] sm:$0xff]  ;;  %v275_v28 = vld [vmem:[#allocation2] sm:$0xff] }
  0x7e   : > { %v613_v26 = vpack.c.bf16 %v292_v25, %v291_v24  ;;  %v276_v27 = vld [vmem:[%s226_s10] sm:$0xff]  ;;  %v533_v33 = vld [vmem:[%s269_s30] ss:$0 sm:$0xff] (!%p532_p13) }
  0x7f   : > { %596 = vmatpush3.bf16.msra.mxu0 %v595_v8 }
  0x80   : > { %597 = vmatprep.subr.bf16.mxu0 %v971_v4 }
  0x83   : > { %599 = vmatpush3.bf16.msra.mxu0 %v598_v11 }
  0x84   : > { %600 = vmatprep.subr.bf16.mxu0 %v971_v4 }
  0x87   : > { %602 = vmatpush3.bf16.msra.mxu0 %v601_v14 }
  0x88   : > { %603 = vmatprep.subr.bf16.mxu0 %v971_v4 }
  0x8b   : > { %605 = vmatpush3.bf16.msra.mxu0 %v604_v17 }
  0x8c   : > { %606 = vmatprep.subr.bf16.mxu0 %v971_v4 }
  0x8f   : > { %608 = vmatpush3.bf16.msra.mxu0 %v607_v20 }
  0x90   : > { %609 = vmatprep.subr.bf16.mxu0 %v971_v4 }
  0x93   : > { %611 = vmatpush3.bf16.msra.mxu0 %v610_v23 }
  0x94   : > { %612 = vmatprep.subr.bf16.mxu0 %v971_v4 }
  0x97   : > { %614 = vmatpush3.bf16.msra.mxu0 %v613_v26 }
  0x9a   : > { %589 = vmatmul.mubr.f32.vlgmr.msra.gmra.mrb[0].mxu0 %v276_v27 }
 0x16a   : > { %368 = sbr.rel (%p532_p13) target bundleno = 379 (0x17b), region = 48 }
 0x16d   : > { %v359_v29 = vpop.f32.mrb[0].mxu0 }
 0x16e   : > { %v363_v30 = vadd.f32 %v359_v29, %v275_v28  ;;  %v590_v31 = vpop.f32.mrb[1].mxu0 }
 0x170   : > { %364 = vst [vmem:[#allocation2] sm:$0xff] %v363_v30 }
 0x177   : > { %v369_v32 = vld [vmem:[#allocation2] sm:$0xff] }
 0x178   : > { %v377_v34 = vadd.f32 %v533_v33, %v369_v32 }
 0x17a   : > { %378 = vst [vmem:[%s265_s5] sm:$0xff] %v377_v34 }
 0x17b PF: > { %s535_s20 = sshll.u32 %s951_s22, 7  ;;  %s395_s28 = sshll.u32 %s265_s5, 4  ;;  %s396_s28 = int_to_ptr.vmem [resolvable:$true] %s395_s28 }
 0x17c   : > { %s1299_s10 = scalar_lea.hbm %s1377_s3, %s535_s20  ;;  %s380_s0 = scalar_lea.sflag [#allocation5], %s263_s7 }
 0x17d   : > { %s813_s26 = scalar_lea.vmem %s396_s28, 128  ;;  %p1409_p12 = scmp.ne.s32.totalorder %s1399_s9, 0 }
 0x17e   : > { %p814_p2 = scmp.ne.s32.totalorder %s396_s28, %s813_s26  ;;  %s974_s11 = smov [#allocation8]  }
 0x17f   : > { %s817_s18 = sshll.u32 %s974_s11, 4  ;;  %s818_s18 = int_to_ptr.vmem [resolvable:$false] %s817_s18 }
 0x180   : > { %p815_p6 = pnand %p814_p2, %p1409_p12  ;;  %s819_s24 = scalar_lea.vmem %s818_s18, 256 }
 0x181   : > { %p820_p0 = scmp.lt.s32.totalorder %s396_s28, %s818_s18  ;;  %p821_p4 = scmp.lt.s32.totalorder %s819_s24, %s813_s26 }
 0x182   : > { %p816_p9 = pneg %p815_p6 }
 0x183   : > { %p822_p7 = por %p821_p4, %p820_p0 }
 0x185   : > { %p823_p1 = pnand %p822_p7, %p816_p9 }
 0x187   : > { %826 = shalt.err (!%p823_p1)
}
 0x188   : > { %s827_s22 = scalar_lea.hbm %s1299_s10, 128  ;;  %s831_s15 = scalar_lea.hbm %s1377_s3, 256 }
 0x189   : > { %p828_p3 = scmp.ne.s32.totalorder %s1299_s10, %s827_s22  ;;  %p832_p8 = scmp.lt.u32.totalorder %s1299_s10, %s1377_s3 }
 0x18a   : > { %p833_p5 = scmp.lt.u32.totalorder %s831_s15, %s827_s22  ;;  %p835_p2 = scmp.lt.u32.totalorder %s827_s22, %s1299_s10 }
 0x18b   : > { %p829_p10 = pnand %p828_p3, %p1409_p12 }
 0x18c   : > { %p834_p13 = por %p833_p5, %p832_p8 }
 0x18d   : > { %p830_p11 = pneg %p829_p10 }
 0x18e   : > { %p836_p6 = por %p835_p2, %p834_p13 }
 0x190   : > { %p837_p9 = pnand %p836_p6, %p830_p11 }
 0x192   : > { %840 = shalt.err (!%p837_p9)
}
 0x193   : > { %619 = dma.vmem_to_hbm [thread:$0]  (%p1409_p12), %s396_s28, 128, %s1299_s10, %s380_s0  }
 0x194 PF: > { %p633_p0 = scmp.ge.s32.totalorder %s963_s25, 2  ;;  %s407_s27 = sand.u32 1, %s911_s12  }
 0x195   : > { %p1410_p4 = scmp.ne.s32.totalorder %s1400_s6, 0  ;;  %s408_s4 = scalar_lea.sflag [#allocation5], %s407_s27 }
 0x197   : > { %p629_p7 = pnand %p633_p0, %p1410_p4 }
 0x199   : > { %906 = dma.done.wait (!%p629_p7), %s408_s4, 128  }
 0x19a   : > { %908 = vsyncadd (!%p629_p7), %s408_s4, 4294967168  ;;  %s22_s25 = sadd.s32 1, %s963_s25   ;;  %s1412_s9 = sld [smem:[#allocation18_spill]] }
 0x19b   : > { %p1327_p1 = scmp.ge.s32.totalorder %s22_s25, 6   ;;  %s1413_s29 = sld [smem:[#allocation17_spill]] }
 0x19c   : > { %s1414_s21 = sld [smem:[#allocation12_spill]]  ;;  %s1415_s10 = sld [smem:[#allocation16_spill]] }
 0x19d   : > { %s1416_s22 = sld [smem:[#allocation13_spill]]  ;;  %s1417_s6 = sld [smem:[#allocation14_spill]] }
 0x19e   : > { %s1418_s24 = sld [smem:[#allocation15_spill]]  ;;  %s1420_s12 = smov %s915_s13 }
 0x19f   : > { %s1421_s13 = smov %s919_s14  ;;  %s1423_s15 = smov %s927_s16 }
 0x1a0   : > { %s1422_s14 = smov %s1412_s9  ;;  %s1424_s16 = smov %s931_s17 }
 0x1a1   : > { %s1425_s17 = smov %s1413_s29  ;;  %s1426_s18 = smov %s939_s19 }
 0x1a2   : > { %s1427_s19 = smov %s1414_s21  ;;  %s1428_s20 = smov %s1415_s10 }
 0x1a3   : > { %s1429_s21 = smov %s955_s23  ;;  %s1430_s23 = smov %s1417_s6 }
 0x1a4   :  { %21 = sbr.rel (!%p1327_p1) target bundleno = 14 (0xe), region = 101 }
 0x1ab   :  { %413 = vsyncpa [#allocation4], 1 }
 0x1ac   :  { %415 = vsyncpa [#allocation4 + $0x1], 1 }
 0x1ad   :  { %416 = vsyncpa [#allocation7], 1 }
 0x1ae   :  { %418 = vsyncpa [#allocation7 + $0x1], 1 }
 0x1af   :  { %419 = vsyncpa [#allocation5], 1 }
 0x1b0   :  { %421 = vsyncpa [#allocation5 + $0x1], 1 }

</bundles_post_ra>
